<compile_context>
chip_gen: v6e
topology: v6e:2x2x1
jax: 0.10.0
libtpu: 0.0.40
codegen_flags: <defaults>
</compile_context>

<pallas_src>
import jax
import jax.numpy as jnp
from jax.experimental import pallas as pl
from jax.experimental.pallas import tpu as pltpu


def gcn_kernel(a_ref, p1_ref, p2_ref, out_ref):
    n = a_ref.shape[0]                 # number of nodes
    hd = p2_ref.shape[0] - 1           # hidden dim

    a = a_ref[...]                     # [N, N] bf16 (0/1 adjacency, exact)
    p1 = p1_ref[...]                   # [N+1, H] f32: rows 0..N-1 = X@W1, row N = b1
    p2 = p2_ref[...]                   # [H+1, C] f32: rows 0..H-1 = W2,  row H = b2

    xw1 = p1[:n].astype(jnp.bfloat16)  # X @ W1 (precomputed in wrapper)
    b1 = p1[n:n + 1]                   # [1, H] f32
    w2 = p2[:hd]                       # [H, C] f32 (kept full precision)
    b2 = p2[hd:hd + 1]                 # [1, C] f32

    # ---- layer 1: GCNConv(F -> H), normalize=False ----
    h = jnp.dot(a, xw1, preferred_element_type=jnp.float32) + b1   # [N, H] f32
    h = jnp.maximum(h, 0.0)            # ReLU

    # F.dropout(x, training=self.training): identity in eval mode.
    # TODO(synk): training-mode dropout (pltpu.prng_random_bits mask) not wired in.

    # ---- layer 2: GCNConv(H -> C), normalize=False ----
    hw2 = jnp.dot(h, w2, preferred_element_type=jnp.float32)       # [N, C] f32 (tiny)
    z = jnp.dot(a, hw2.astype(jnp.bfloat16),
                preferred_element_type=jnp.float32) + b2           # [N, C] f32

    # ---- log_softmax over classes (dim=1), numerically stable, in f32 ----
    m = jnp.max(z, axis=1, keepdims=True)
    lse = m + jnp.log(jnp.sum(jnp.exp(z - m), axis=1, keepdims=True))
    out_ref[...] = z - lse


@jax.jit
def gcn_forward(x, a, w1, b1, w2, b2):
    n = x.shape[0]
    c = w2.shape[1]
    # Hoist X @ W1 (identity one-hot features -> effectively just W1) and fold
    # biases into packed parameter slabs so the kernel sees only 3 inputs.
    xw1_b1 = jnp.concatenate([x.astype(jnp.float32) @ w1, b1], axis=0)   # [N+1, H]
    w2_b2 = jnp.concatenate([w2, b2], axis=0)                            # [H+1, C]
    a_bf16 = a.astype(jnp.bfloat16)    # 0/1 adjacency, exact in bf16
    return pl.pallas_call(
        gcn_kernel,
        out_shape=jax.ShapeDtypeStruct((n, c), jnp.float32),
        # Everything is tiny (N=34) -> whole arrays live in VMEM, no grid.
        in_specs=[pl.BlockSpec(memory_space=pltpu.MemorySpace.VMEM)] * 3,
        out_specs=pl.BlockSpec(memory_space=pltpu.MemorySpace.VMEM),
    )(a_bf16, xw1_b1, w2_b2)


def gcn_reference(x, a, w1, b1, w2, b2):
    h = jnp.maximum(a @ (x @ w1) + b1, 0.0)
    z = a @ (h @ w2) + b2
    return jax.nn.log_softmax(z, axis=1)


def _glorot(key, shape):
    fan_in, fan_out = shape
    limit = (6.0 / (fan_in + fan_out)) ** 0.5
    return jax.random.uniform(key, shape, jnp.float32, -limit, limit)


if __name__ == "__main__":
    # KarateClub-like synthetic graph: N=34 nodes, num_features=34 (one-hot),
    # num_classes=4, hidden=16.
    N, F, H, C = 34, 34, 16, 4
    key = jax.random.PRNGKey(0)
    k_adj, k_w1, k_b1, k_w2, k_b2 = jax.random.split(key, 5)

    # Node features: identity one-hot, exactly as in KarateClub.
    x = jnp.eye(N, F, dtype=jnp.float32)

    # Deterministic symmetric adjacency (edge_weight=None -> all-ones weights).
    upper = (jax.random.uniform(k_adj, (N, N)) < 0.15).astype(jnp.float32)
    upper = jnp.triu(upper, k=1)
    a = upper + upper.T                                   # [N, N], no self loops

    # GCNConv parameters (deterministic glorot init, zero bias).
    w1 = _glorot(k_w1, (F, H))
    b1 = jnp.zeros((1, H), jnp.float32)
    w2 = _glorot(k_w2, (H, C))
    b2 = jnp.zeros((1, C), jnp.float32)

    out = gcn_forward(x, a, w1, b1, w2, b2)
    out = jax.block_until_ready(out)

    assert out.shape == (N, C)
    # rows of exp(log_softmax) must sum to ~1
    assert bool(jnp.allclose(jnp.sum(jnp.exp(out), axis=1), 1.0, atol=1e-4))
    # match the pure-f32 reference (bf16 MXU inputs -> loose but meaningful tol)
    ref = gcn_reference(x, a, w1, b1, w2, b2)
    assert bool(jnp.allclose(out, ref, atol=1e-1))
    print("KERNEL_OK")
</pallas_src>

<mosaic_0001>
module attributes {stable_mosaic.version = 11 : i64} {
  func.func @gcn_kernel(%arg0: memref<34x34xbf16, #tpu.memory_space<vmem>>, %arg1: memref<35x16xf32, #tpu.memory_space<vmem>>, %arg2: memref<17x4xf32, #tpu.memory_space<vmem>>, %arg3: memref<34x4xf32, #tpu.memory_space<vmem>>) attributes {dimension_semantics = [], scalar_prefetch = 0 : i64, scratch_operands = 0 : i64, tpu.core_type = #tpu.core_type<tc>} {
    %c0 = arith.constant 0 : index
    %c0_0 = arith.constant 0 : index
    %0 = vector.load %arg0[%c0, %c0_0] : memref<34x34xbf16, #tpu.memory_space<vmem>>, vector<34x34xbf16>
    %c0_1 = arith.constant 0 : index
    %c0_2 = arith.constant 0 : index
    %1 = vector.load %arg1[%c0_1, %c0_2] : memref<35x16xf32, #tpu.memory_space<vmem>>, vector<35x16xf32>
    %c0_3 = arith.constant 0 : index
    %c0_4 = arith.constant 0 : index
    %2 = vector.load %arg2[%c0_3, %c0_4] : memref<17x4xf32, #tpu.memory_space<vmem>>, vector<17x4xf32>
    %3 = vector.extract_strided_slice %1 {offsets = [0, 0], sizes = [34, 16], strides = [1, 1]} : vector<35x16xf32> to vector<34x16xf32>
    %4 = arith.truncf %3 : vector<34x16xf32> to vector<34x16xbf16>
    %5 = vector.extract_strided_slice %1 {offsets = [34, 0], sizes = [1, 16], strides = [1, 1]} : vector<35x16xf32> to vector<1x16xf32>
    %6 = vector.extract_strided_slice %2 {offsets = [0, 0], sizes = [16, 4], strides = [1, 1]} : vector<17x4xf32> to vector<16x4xf32>
    %7 = vector.extract_strided_slice %2 {offsets = [16, 0], sizes = [1, 4], strides = [1, 1]} : vector<17x4xf32> to vector<1x4xf32>
    %cst = arith.constant dense<0.000000e+00> : vector<34x16xf32>
    %8 = tpu.matmul %0, %4, %cst {dimension_numbers = #tpu.dot_dimension_numbers<[1], [0], [0], [1], [0, 0, 1, 1], [], []>} : vector<34x34xbf16>, vector<34x16xbf16>, vector<34x16xf32> -> vector<34x16xf32>
    %9 = vector.broadcast %5 : vector<1x16xf32> to vector<34x16xf32>
    %10 = arith.addf %8, %9 : vector<34x16xf32>
    %cst_5 = arith.constant 0.000000e+00 : f32
    %11 = vector.broadcast %cst_5 : f32 to vector<34x16xf32>
    %12 = arith.maximumf %10, %11 : vector<34x16xf32>
    %cst_6 = arith.constant dense<0.000000e+00> : vector<34x4xf32>
    %13 = tpu.matmul %12, %6, %cst_6 {dimension_numbers = #tpu.dot_dimension_numbers<[1], [0], [0], [1], [0, 0, 1, 1], [], []>} : vector<34x16xf32>, vector<16x4xf32>, vector<34x4xf32> -> vector<34x4xf32>
    %14 = arith.truncf %13 : vector<34x4xf32> to vector<34x4xbf16>
    %cst_7 = arith.constant dense<0.000000e+00> : vector<34x4xf32>
    %15 = tpu.matmul %0, %14, %cst_7 {dimension_numbers = #tpu.dot_dimension_numbers<[1], [0], [0], [1], [0, 0, 1, 1], [], []>} : vector<34x34xbf16>, vector<34x4xbf16>, vector<34x4xf32> -> vector<34x4xf32>
    %16 = vector.broadcast %7 : vector<1x4xf32> to vector<34x4xf32>
    %17 = arith.addf %15, %16 : vector<34x4xf32>
    %cst_8 = arith.constant dense<0xFF800000> : vector<34xf32>
    %18 = vector.multi_reduction <maximumf>, %17, %cst_8 [1] : vector<34x4xf32> to vector<34xf32>
    %19 = vector.shape_cast %18 : vector<34xf32> to vector<34x1xf32>
    %20 = vector.broadcast %19 : vector<34x1xf32> to vector<34x4xf32>
    %21 = arith.subf %17, %20 : vector<34x4xf32>
    %22 = math.exp %21 : vector<34x4xf32>
    %cst_9 = arith.constant dense<0.000000e+00> : vector<34xf32>
    %23 = vector.multi_reduction <add>, %22, %cst_9 [1] : vector<34x4xf32> to vector<34xf32>
    %24 = vector.shape_cast %23 : vector<34xf32> to vector<34x1xf32>
    %25 = math.log %24 : vector<34x1xf32>
    %26 = arith.addf %19, %25 : vector<34x1xf32>
    %27 = vector.broadcast %26 : vector<34x1xf32> to vector<34x4xf32>
    %28 = arith.subf %17, %27 : vector<34x4xf32>
    %c0_10 = arith.constant 0 : index
    %c0_11 = arith.constant 0 : index
    %29 = vector.load %arg3[%c0_10, %c0_11] : memref<34x4xf32, #tpu.memory_space<vmem>>, vector<34x4xf32>
    tpu.vector_store %arg3[%c0_10, %c0_11], %28 {strides = array<i32>} : memref<34x4xf32, #tpu.memory_space<vmem>>, vector<34x4xf32>,
    return
  }
}

</mosaic_0001>

<bundles_post_ra>
// kernel: gcn_forward.1
= control target key start
LH: loop header
LB: loop body
LE: loop exit
PB: predicated region body
PF: predicated region fallthrough
CT: control target
= control target key end

     0   :  { %v489_v0 = vmov 0.0   ;;  %vm58_vm0 = vcmask 1040384   ;;  %vm490_vm1 = vmmov 0   ;;  %vm48_vm2 = vcmask 277504   ;;  %s656_s1 = inlined_call_operand.vmem [shape: f32[35,16], index: 1, kind: input, shape index: {}]   ;;  %s657_s0 = inlined_call_operand.vmem [shape: bf16[34,34], index: 0, kind: input, shape index: {}]   ;;  %s658_s2 = inlined_call_operand.vmem [shape: f32[17,4], index: 2, kind: input, shape index: {}]   ;;  %s659_s3 = inlined_call_operand.vmem [shape: f32[34,4], index: 3, kind: output, shape index: {}]  }
   0x1   :  { %405 = vmatprep.subr.bf16.mxu0 %v489_v0  ;;  %v24_v1 = vld [vmem:[%s656_s1 + $0x20] sm:$0x7]  ;;  %411 = vmatprep.mubr.msk.bf16.mxu0 %vm490_vm1, %v489_v0  ;;  %v22_v3 = vld [vmem:[%s656_s1 + $0x10] sm:$0xff]  ;;  %v23_v4 = vld [vmem:[%s656_s1 + $0x18] sm:$0xff]  ;;  %v31_v15 = vlaneseq  ;;  %vm123_vm3 = vcmask 130048   ;;  %vm295_vm4 = vcmask 31744  }
   0x2   :  { %v30_v2 = vpack.c.bf16 %v24_v1, %v24_v1  ;;  %460 = vmatprep.subr.mxu1 %v489_v0  ;;  %433 = vmatprep.mubr.msk.f32.mxu1 %vm490_vm1, %v489_v0  ;;  %v29_v6 = vpack.c.bf16 %v23_v4, %v22_v3  ;;  %v20_v7 = vld [vmem:[%s656_s1] sm:$0xff]  ;;  %v21_v8 = vld [vmem:[%s656_s1 + $0x8] sm:$0xff]  ;;  %v557_v12 = vld [vmem:[%s657_s0 + $0x10] ss:$0 sps:$4 sm:$0x11]   ;;  %vm308_vm5 = vcmask 25600  }
   0x3   :  { %v28_v9 = vpack.c.bf16 %v21_v8, %v20_v7  ;;  %v538_v10 = vld [vmem:[%s657_s0] sm:$0xff]   ;;  %v548_v11 = vld [vmem:[%s657_s0 + $0x8] sm:$0xff]   ;;  %v32_v16 = vshrl.u32 %v31_v15, 7  ;;  %v382_v55 = vld [vmem:[%s658_s2 + $0x10] ss:$0 sm:$0xff] }
   0x4   :  { %v60_v5 = vsel %vm58_vm0, %v30_v2, 0  ;;  %v26_v13 = vld [vmem:[%s658_s2 + $0x8] sm:$0xff]  ;;  %v25_v14 = vld [vmem:[%s658_s2] sm:$0xff] }
   0x5   :  { %406 = vmatpush3.bf16.msra.mxu0 %v60_v5  ;;  %462 = vmatpush3.msra.mxu1 %v26_v13  ;;  %v33_v17 = vsub.s32 2, %v32_v16 }
   0x6   :  { %407 = vmatprep.subr.bf16.mxu0 %v489_v0  ;;  %461 = vmatprep.subr.mxu1 %v489_v0 }
   0x7   :  { %463 = vmatpush3.msra.mxu1 %v25_v14  ;;  %v34_v18 = vrot.slane %v24_v1, %v33_v17 }
   0x8   :  { %442 = vmatprep.subr.bf16.mxu1 %v489_v0 }
   0x9   :  { %408 = vmatpush3.bf16.msra.mxu0 %v29_v6 }
   0xa   :  { %409 = vmatprep.subr.bf16.mxu0 %v489_v0 }
   0xd   :  { %410 = vmatpush3.bf16.msra.mxu0 %v28_v9 }
   0xe   :  { %423 = vmatprep.subr.mxu0 %v489_v0 }
  0x10   :  { %412 = vmatmul.mubr.msk.bf16.vlgmr.msra.gmra.mxu0 %vm48_vm2, %v538_v10 }
  0x11   :  { %415 = vmatprep.mubr.msk.bf16.mxu0 %vm490_vm1, %v489_v0  ;;  %424 = vmatpush3.msra.mxu0 %v26_v13 }
  0x12   :  { %425 = vmatprep.subr.mxu0 %v489_v0 }
  0x13   :  { %426 = vmatpush3.msra.mxu0 %v25_v14 }
  0x18   :  { %416 = vmatmul.mubr.msk.bf16.gmra.mxu0 %vm48_vm2, %v548_v11 }
  0x19   :  { %419 = vmatprep.mubr.msk.bf16.mxu0 %vm490_vm1, %v489_v0 }
  0x20   :  { %420 = vmatmul.mubr.msk.bf16.gmra.mxu0 %vm48_vm2, %v557_v12 }
  0x21   :  { %427 = vmatprep.mubr.msk.f32.mxu0 %vm490_vm1, %v489_v0 }
  0xd0   :  { %v96_v19 = vpop.f32.mrf.mxu0 }
  0xd1   :  { %v97_v20 = vadd.f32 %v96_v19, %v34_v18 }
  0xd2   :  { %v413_v21 = vpop.f32.mrf.mxu0 }
  0xd3   :  { %v118_v22 = vmax.f32 %v97_v20, 0.0 }
  0xd4   :  { %v99_v23 = vpop.f32.mrf.mxu0 }
  0xd5   :  { %v100_v24 = vadd.f32 %v99_v23, %v34_v18  ;;  %428 = vmatmul.mubr.msk.f32.vlgmr.msra.gmra.mxu0 %vm123_vm3, %v118_v22 }
  0xd6   :  { %v414_v25 = vpop.f32.mrf.mxu0  ;;  %430 = vmatprep.mubr.msk.f32.mxu0 %vm490_vm1, %v489_v0 }
  0xd7   :  { %v119_v26 = vmax.f32 %v100_v24, 0.0 }
  0xd8   :  { %v104_v27 = vpop.f32.mrf.mxu0 }
  0xd9   :  { %v105_v28 = vadd.f32 %v104_v27, %v34_v18  ;;  %431 = vmatmul.mubr.msk.f32.gmra.mxu0 %vm123_vm3, %v119_v26 }
  0xda   :  { %v417_v29 = vpop.f32.mrf.mxu0 }
  0xdb   :  { %v120_v30 = vmax.f32 %v105_v28, 0.0 }
  0xdc   :  { %v107_v31 = vpop.f32.mrf.mxu0 }
  0xdd   :  { %v108_v32 = vadd.f32 %v107_v31, %v34_v18  ;;  %434 = vmatmul.mubr.msk.f32.vlgmr.msra.gmra.mxu1 %vm123_vm3, %v120_v30 }
  0xde   :  { %v418_v33 = vpop.f32.mrf.mxu0  ;;  %436 = vmatprep.mubr.msk.f32.mxu1 %vm490_vm1, %v489_v0 }
  0xdf   :  { %v121_v34 = vmax.f32 %v108_v32, 0.0 }
  0xe0   :  { %v112_v35 = vpop.f32.mrf.mxu0 }
  0xe1   :  { %v113_v36 = vadd.f32 %v112_v35, %v34_v18  ;;  %437 = vmatmul.mubr.msk.f32.gmra.mxu1 %vm123_vm3, %v121_v34 }
  0xe2   :  { %v421_v37 = vpop.f32.mrf.mxu0  ;;  %439 = vmatprep.mubr.msk.f32.mxu1 %vm490_vm1, %v489_v0 }
  0xe3   :  { %v122_v38 = vmax.f32 %v113_v36, 0.0 }
  0xe4   :  { %v115_v39 = vpop.f32.mrf.mxu0 }
  0xe5   :  { %440 = vmatmul.mubr.msk.f32.gmra.mxu1 %vm123_vm3, %v122_v38 }
  0xe6   :  { %v422_v40 = vpop.f32.mrf.mxu0  ;;  %448 = vmatprep.mubr.msk.bf16.mxu1 %vm490_vm1, %v489_v0 }
 0x195   :  { %v205_v41 = vpop.f32.mrf.mxu0 }
 0x197   :  { %v429_v42 = vpop.f32.mrf.mxu0 }
 0x199   :  { %v210_v43 = vpop.f32.mrf.mxu0 }
 0x19a   :  { %v229_v54 = vpack.c.bf16 %v210_v43, %v205_v41 }
 0x19b   :  { %v432_v44 = vpop.f32.mrf.mxu0 }
 0x19d   :  { %v215_v45 = vpop.f32.mrf.mxu1 }
 0x19f   :  { %v435_v46 = vpop.f32.mrf.mxu1 }
 0x1a1   :  { %v220_v47 = vpop.f32.mrf.mxu1 }
 0x1a2   :  { %v230_v53 = vpack.c.bf16 %v220_v47, %v215_v45 }
 0x1a3   :  { %v438_v48 = vpop.f32.mrf.mxu1 }
 0x1a5   :  { %v225_v49 = vpop.f32.mrf.mxu1 }
 0x1a6   :  { %v231_v50 = vpack.c.bf16 %v225_v49, %v225_v49 }
 0x1a7   :  { %v441_v51 = vpop.f32.mrf.mxu1 }
 0x1a8   :  { %v237_v52 = vsel %vm58_vm0, %v231_v50, 0 }
 0x1a9   :  { %443 = vmatpush3.bf16.msra.mxu1 %v237_v52 }
 0x1aa   :  { %444 = vmatprep.subr.bf16.mxu1 %v489_v0 }
 0x1ad   :  { %445 = vmatpush3.bf16.msra.mxu1 %v230_v53 }
 0x1ae   :  { %446 = vmatprep.subr.bf16.mxu1 %v489_v0 }
 0x1b1   :  { %447 = vmatpush3.bf16.msra.mxu1 %v229_v54 }
 0x1b4   :  { %449 = vmatmul.mubr.msk.bf16.vlgmr.msra.gmra.mxu1 %vm48_vm2, %v538_v10 }
 0x1b5   :  { %452 = vmatprep.mubr.msk.bf16.mxu1 %vm490_vm1, %v489_v0 }
 0x1bc   :  { %453 = vmatmul.mubr.msk.bf16.gmra.mxu1 %vm48_vm2, %v548_v11 }
 0x1bd   :  { %456 = vmatprep.mubr.msk.bf16.mxu1 %vm490_vm1, %v489_v0 }
 0x1c4   :  { %457 = vmatmul.mubr.msk.bf16.gmra.mxu1 %vm48_vm2, %v557_v12 }
 0x274   :  { %v273_v56 = vpop.f32.mrf.mxu1 }
 0x275   :  { %v601_v57 = vadd.f32 %v382_v55, %v273_v56 }
 0x276   :  { %v450_v58 = vpop.f32.mrf.mxu1 }
 0x277   :  { %v296_v59 = vsel %vm295_vm4, %v601_v57, -inf }
 0x278   :  { %297 = vmax.xlane.f32.xlu0 %v296_v59  ;;  %v276_v60 = vpop.f32.mrf.mxu1 }
 0x279   :  { %v605_v61 = vadd.f32 %v382_v55, %v276_v60 }
 0x27a   :  { %v451_v62 = vpop.f32.mrf.mxu1 }
 0x27b   :  { %v299_v63 = vsel %vm295_vm4, %v605_v61, -inf }
 0x27c   :  { %300 = vmax.xlane.f32.xlu0 %v299_v63  ;;  %v281_v0 = vpop.f32.mrf.mxu1 }
 0x27d   :  { %v609_v1 = vadd.f32 %v382_v55, %v281_v0 }
 0x27e   :  { %v454_v2 = vpop.f32.mrf.mxu1 }
 0x27f   :  { %v302_v3 = vsel %vm295_vm4, %v609_v1, -inf }
 0x280   :  { %303 = vmax.xlane.f32.xlu1 %v302_v3  ;;  %v284_v4 = vpop.f32.mrf.mxu1 }
 0x281   :  { %v613_v5 = vadd.f32 %v382_v55, %v284_v4 }
 0x282   :  { %v455_v6 = vpop.f32.mrf.mxu1 }
 0x283   :  { %v305_v7 = vsel %vm295_vm4, %v613_v5, -inf }
 0x284   :  { %306 = vmax.xlane.f32.xlu1 %v305_v7  ;;  %v289_v8 = vpop.f32.mrf.mxu1 }
 0x285   :  { %v617_v9 = vadd.f32 %v382_v55, %v289_v8 }
 0x286   :  { %v458_v10 = vpop.f32.mrf.mxu1 }
 0x287   :  { %v309_v11 = vsel %vm308_vm5, %v617_v9, -inf }
 0x288   :  { %310 = vmax.xlane.f32.xlu0 %v309_v11  ;;  %v292_v12 = vpop.f32.mrf.mxu1 }
 0x28a   :  { %v459_v13 = vpop.f32.mrf.mxu1 }
 0x301   :  { %v298_v14 = vpop.xlane.xlu0 %297 }
 0x302   :  { %v312_v15 = vsub.f32 %v601_v57, %v298_v14 }
 0x304   :  { %v317_v16 = vmul.f32 1.442695, %v312_v15 }
 0x305   :  { %v301_v17 = vpop.xlane.xlu0 %300 }
 0x306   :  { %469 = vpow2.f32 %v317_v16  ;;  %v313_v18 = vsub.f32 %v605_v61, %v301_v17 }
 0x308   :  { %v319_v19 = vmul.f32 1.442695, %v313_v18 }
 0x309   :  { %v304_v20 = vpop.xlane.xlu1 %303 }
 0x30a   :  { %471 = vpow2.f32 %v319_v19  ;;  %v314_v21 = vsub.f32 %v609_v1, %v304_v20 }
 0x30c   :  { %v321_v22 = vmul.f32 1.442695, %v314_v21 }
 0x30d   :  { %v307_v23 = vpop.xlane.xlu1 %306 }
 0x30e   :  { %473 = vpow2.f32 %v321_v22  ;;  %v315_v24 = vsub.f32 %v613_v5, %v307_v23 }
 0x310   :  { %v323_v25 = vmul.f32 1.442695, %v315_v24 }
 0x311   :  { %v311_v26 = vpop.xlane.xlu0 %310 }
 0x312   :  { %475 = vpow2.f32 %v323_v25  ;;  %v316_v27 = vsub.f32 %v617_v9, %v311_v26 }
 0x313   :  { %v470_v28 = vpop.eup %469 }
 0x314   :  { %v325_v29 = vmul.f32 1.442695, %v316_v27  ;;  %v327_v30 = vsel %vm295_vm4, %v470_v28, 0.0 }
 0x315   :  { %328 = vadd.xlane.f32.xlu1 %v327_v30 }
 0x316   :  { %477 = vpow2.f32 %v325_v29 }
 0x317   :  { %v472_v31 = vpop.eup %471 }
 0x318   :  { %v330_v32 = vsel %vm295_vm4, %v472_v31, 0.0 }
 0x319   :  { %331 = vadd.xlane.f32.xlu0 %v330_v32 }
 0x31b   :  { %v474_v33 = vpop.eup %473 }
 0x31c   :  { %v333_v34 = vsel %vm295_vm4, %v474_v33, 0.0 }
 0x31d   :  { %334 = vadd.xlane.f32.xlu1 %v333_v34 }
 0x31f   :  { %v476_v35 = vpop.eup %475 }
 0x320   :  { %v336_v36 = vsel %vm295_vm4, %v476_v35, 0.0 }
 0x321   :  { %337 = vadd.xlane.f32.xlu0 %v336_v36 }
 0x323   :  { %v478_v37 = vpop.eup %477 }
 0x324   :  { %v339_v38 = vsel %vm308_vm5, %v478_v37, 0.0 }
 0x325   :  { %340 = vadd.xlane.f32.xlu1 %v339_v38 }
 0x39e   :  { %v329_v39 = vpop.xlane.xlu1 %328 }
 0x39f   :  { %479 = vlog2.f32 %v329_v39 }
 0x3a2   :  { %v332_v40 = vpop.xlane.xlu0 %331 }
 0x3a3   :  { %481 = vlog2.f32 %v332_v40 }
 0x3a6   :  { %v335_v41 = vpop.xlane.xlu1 %334 }
 0x3a7   :  { %483 = vlog2.f32 %v335_v41 }
 0x3aa   :  { %v338_v42 = vpop.xlane.xlu0 %337 }
 0x3ab   :  { %485 = vlog2.f32 %v338_v42 }
 0x3ac   :  { %v480_v43 = vpop.eup %479 }
 0x3ad   :  { %v343_v44 = vmul.f32 0.6931472, %v480_v43 }
 0x3ae   :  { %v341_v45 = vpop.xlane.xlu1 %340 }
 0x3af   :  { %v352_v46 = vadd.f32 %v343_v44, %v298_v14  ;;  %487 = vlog2.f32 %v341_v45 }
 0x3b0   :  { %v482_v47 = vpop.eup %481 }
 0x3b1   :  { %v357_v48 = vsub.f32 %v601_v57, %v352_v46  ;;  %v345_v49 = vmul.f32 0.6931472, %v482_v47 }
 0x3b3   :  { %362 = vst.msk [vmem:[%s659_s3] sm:$0xff] %vm295_vm4, %v357_v48  ;;  %v353_v50 = vadd.f32 %v345_v49, %v301_v17 }
 0x3b4   :  { %v484_v51 = vpop.eup %483 }
 0x3b5   :  { %v358_v52 = vsub.f32 %v605_v61, %v353_v50  ;;  %v347_v53 = vmul.f32 0.6931472, %v484_v51 }
 0x3b7   :  { %363 = vst.msk [vmem:[%s659_s3 + $0x8] sm:$0xff] %vm295_vm4, %v358_v52  ;;  %v354_v54 = vadd.f32 %v347_v53, %v304_v20 }
 0x3b8   :  { %v486_v55 = vpop.eup %485 }
 0x3b9   :  { %v359_v56 = vsub.f32 %v609_v1, %v354_v54  ;;  %v349_v57 = vmul.f32 0.6931472, %v486_v55 }
 0x3bb   :  { %364 = vst.msk [vmem:[%s659_s3 + $0x10] sm:$0xff] %vm295_vm4, %v359_v56  ;;  %v355_v58 = vadd.f32 %v349_v57, %v307_v23 }
 0x3bc   :  { %v488_v59 = vpop.eup %487 }
 0x3bd   :  { %v360_v60 = vsub.f32 %v613_v5, %v355_v58  ;;  %v351_v61 = vmul.f32 0.6931472, %v488_v59 }
 0x3bf   :  { %365 = vst.msk [vmem:[%s659_s3 + $0x18] sm:$0xff] %vm295_vm4, %v360_v60  ;;  %v356_v62 = vadd.f32 %v351_v61, %v311_v26 }
 0x3c1   :  { %v361_v63 = vsub.f32 %v617_v9, %v356_v62 }
 0x3c3   :  { %366 = vst.msk [vmem:[%s659_s3 + $0x20] sm:$0x3] %vm308_vm5, %v361_v63 }

</bundles_post_ra>
